<compile_context>
chip_gen: v7x
topology: tpu7x:2x2x1
jax: 0.10.0
libtpu: 0.0.40
codegen_flags: <defaults>
</compile_context>

<pallas_src>
import jax
import jax.numpy as jnp
from jax.experimental import pallas as pl
from jax.experimental.pallas import tpu as pltpu

LANE = 128


def _round_up(n, m):
    return ((n + m - 1) // m) * m


def attention_kernel(x_ref, w_ref, b_ref, u_ref, o_ref):
    """One batch tile of attention pooling.

    x_ref: (TB, T, Fp)  input features (Fp lane-dense)
    w_ref: (Fp, Ap)     attention projection
    b_ref: (1, Ap)      bias row
    u_ref: (1, Ap)      context vector as a lane-dense row
    o_ref: (TB, Fp)     pooled output
    """
    x = x_ref[...]                                   # (TB, T, Fp)
    tb, t, fp = x.shape
    ap = w_ref.shape[1]

    # ---- scores: v = tanh(X W + b), score = <v, u> -------------------------
    # One lane-dense 2D MXU matmul over the flattened (TB*T) rows. T stays the
    # full time dim, so the collapse is layout-preserving when T % 8 == 0.
    xf = x.reshape(tb * t, fp)
    v = jnp.tanh(
        jnp.dot(xf, w_ref[...], preferred_element_type=jnp.float32) + b_ref[...]
    )                                                # (TB*T, Ap) f32
    # <v, u>: VPU multiply + cross-lane reduce (avoids a lane-width-1 matmul).
    score = jnp.sum(v.reshape(tb, t, ap) * u_ref[...], axis=-1)   # (TB, T) f32

    # ---- softmax over time (max-subtracted for numerical stability) --------
    m = jnp.max(score, axis=-1, keepdims=True)
    e = jnp.exp(score - m)
    inv_denom = pl.reciprocal(jnp.sum(e, axis=-1, keepdims=True), approx=True)
    alphas = e * inv_denom                           # (TB, T) f32

    # ---- weighted pooling over time on the MXU ------------------------------
    pooled = jnp.einsum(
        "bqt,btf->bqf",
        alphas[:, None, :].astype(x.dtype),
        x,
        preferred_element_type=jnp.float32,
    )                                                # (TB, 1, Fp)
    o_ref[...] = pooled[:, 0, :].astype(o_ref.dtype)


def attention_layer(x, w, b, u, *, batch_tile=None):
    """Pallas implementation of AttentionLayer.forward.

    x: (B, T, F), w: (F, A), b: (A,), u: (A,)   returns: (B, F)
    """
    B, T, F = x.shape
    A = w.shape[1]

    Fp = _round_up(F, LANE)
    Ap = _round_up(A, LANE)

    # Lane-dense zero padding is mathematically a no-op here: zero columns of
    # W/b give tanh(0)=0 and zero entries of u add 0 to the score; padded
    # feature columns contribute 0 and are sliced off at the end.
    x_p = jnp.pad(x, ((0, 0), (0, 0), (0, Fp - F))) if Fp != F else x
    w_p = jnp.pad(w, ((0, Fp - F), (0, Ap - A)))
    b_p = jnp.pad(b.reshape(1, A), ((0, 0), (0, Ap - A)))
    u_p = jnp.pad(u.reshape(1, A), ((0, 0), (0, Ap - A)))

    # Batch tile: keep one x tile around ~4 MiB so the double-buffered pipeline
    # stays well inside v7x's smaller VMEM (v5e/v6e have even more headroom).
    if batch_tile is None:
        budget_bytes = 4 * 1024 * 1024
        rows = max(8, min(512, budget_bytes // (T * Fp * 4)))
        batch_tile = (rows // 8) * 8
    if B <= batch_tile:
        batch_tile = B                   # full-dim block is always legal
    Bp = _round_up(B, batch_tile)
    if Bp != B:
        x_p = jnp.pad(x_p, ((0, Bp - B), (0, 0), (0, 0)))

    grid = (Bp // batch_tile,)

    out = pl.pallas_call(
        attention_kernel,
        out_shape=jax.ShapeDtypeStruct((Bp, Fp), x.dtype),
        grid_spec=pltpu.PrefetchScalarGridSpec(
            num_scalar_prefetch=0,
            grid=grid,
            in_specs=[
                pl.BlockSpec((batch_tile, T, Fp), lambda i: (i, 0, 0)),
                pl.BlockSpec((Fp, Ap), lambda i: (0, 0)),   # weights stay resident
                pl.BlockSpec((1, Ap), lambda i: (0, 0)),
                pl.BlockSpec((1, Ap), lambda i: (0, 0)),
            ],
            out_specs=pl.BlockSpec((batch_tile, Fp), lambda i: (i, 0)),
        ),
        compiler_params=pltpu.CompilerParams(
            dimension_semantics=("parallel",),   # megacore / v7x: split batch tiles
            vmem_limit_bytes=32 * 1024 * 1024,
        ),
    )(x_p, w_p, b_p, u_p)

    return out[:B, :F]


def attention_layer_ref(x, w, b, u):
    """Pure-JAX reference matching the PyTorch forward."""
    B, T, F = x.shape
    v = jnp.tanh(x.reshape(-1, F) @ w + b.reshape(1, -1))
    vu = v @ u.reshape(-1, 1)
    exps = jnp.exp(vu).reshape(-1, T)
    alphas = exps / jnp.sum(exps, axis=1, keepdims=True)
    return jnp.sum(x * alphas[:, :, None], axis=1)


if __name__ == "__main__":
    # Small shapes consistent with the module: feature_size=32, time_dim=8,
    # attention_size=16, batch=2.
    B, T, F, A = 2, 8, 32, 16

    key = jax.random.PRNGKey(0)
    kx, kw, kb, ku = jax.random.split(key, 4)
    x = jax.random.normal(kx, (B, T, F), dtype=jnp.float32)
    w = jax.random.normal(kw, (F, A), dtype=jnp.float32)
    b = jax.random.normal(kb, (A,), dtype=jnp.float32)
    u = jax.random.normal(ku, (A,), dtype=jnp.float32)

    out = jax.jit(attention_layer)(x, w, b, u)
    jax.block_until_ready(out)

    ref = attention_layer_ref(x, w, b, u)
    assert out.shape == (B, F)
    # Tolerance accounts for the EUP approximate reciprocal in the softmax
    # normalization (~1e-4 relative) and the max-subtracted exp ordering.
    assert jnp.allclose(out, ref, atol=5e-3, rtol=5e-3), "mismatch vs reference"

    print("KERNEL_OK")
</pallas_src>

<mosaic_0001>
module attributes {stable_mosaic.version = 11 : i64} {
  func.func @attention_kernel(%arg0: i32, %arg1: memref<2x8x128xf32, #tpu.memory_space<vmem>>, %arg2: memref<128x128xf32, #tpu.memory_space<vmem>>, %arg3: memref<1x128xf32, #tpu.memory_space<vmem>>, %arg4: memref<1x128xf32, #tpu.memory_space<vmem>>, %arg5: memref<2x128xf32, #tpu.memory_space<vmem>>) attributes {dimension_semantics = [#tpu.dimension_semantics<parallel>], iteration_bounds = array<i64: 1>, scalar_prefetch = 0 : i64, scratch_operands = 0 : i64, tpu.core_type = #tpu.core_type<tc>, window_params = [{transform_indices = @transform_0, window_bounds = array<i64: 2, 8, 128>}, {pipeline_mode = #tpu.pipeline_mode<synchronous>, transform_indices = @transform_1, window_bounds = array<i64: 128, 128>}, {pipeline_mode = #tpu.pipeline_mode<synchronous>, transform_indices = @transform_2, window_bounds = array<i64: 1, 128>}, {pipeline_mode = #tpu.pipeline_mode<synchronous>, transform_indices = @transform_3, window_bounds = array<i64: 1, 128>}, {transform_indices = @transform_4, window_bounds = array<i64: 2, 128>}]} {
    %c0 = arith.constant 0 : index
    %c0_0 = arith.constant 0 : index
    %c0_1 = arith.constant 0 : index
    %0 = vector.load %arg1[%c0, %c0_0, %c0_1] : memref<2x8x128xf32, #tpu.memory_space<vmem>>, vector<2x8x128xf32>
    %1 = vector.shape_cast %0 : vector<2x8x128xf32> to vector<16x128xf32>
    %c0_2 = arith.constant 0 : index
    %c0_3 = arith.constant 0 : index
    %2 = vector.load %arg2[%c0_2, %c0_3] : memref<128x128xf32, #tpu.memory_space<vmem>>, vector<128x128xf32>
    %cst = arith.constant dense<0.000000e+00> : vector<16x128xf32>
    %3 = tpu.matmul %1, %2, %cst {dimension_numbers = #tpu.dot_dimension_numbers<[1], [0], [0], [1], [0, 0, 1, 1], [], []>} : vector<16x128xf32>, vector<128x128xf32>, vector<16x128xf32> -> vector<16x128xf32>
    %c0_4 = arith.constant 0 : index
    %c0_5 = arith.constant 0 : index
    %4 = vector.load %arg3[%c0_4, %c0_5] : memref<1x128xf32, #tpu.memory_space<vmem>>, vector<1x128xf32>
    %5 = vector.broadcast %4 : vector<1x128xf32> to vector<16x128xf32>
    %6 = arith.addf %3, %5 : vector<16x128xf32>
    %7 = math.tanh %6 : vector<16x128xf32>
    %8 = vector.shape_cast %7 : vector<16x128xf32> to vector<2x8x128xf32>
    %c0_6 = arith.constant 0 : index
    %c0_7 = arith.constant 0 : index
    %9 = vector.load %arg4[%c0_6, %c0_7] : memref<1x128xf32, #tpu.memory_space<vmem>>, vector<1x128xf32>
    %10 = vector.shape_cast %9 : vector<1x128xf32> to vector<1x1x128xf32>
    %11 = vector.broadcast %10 : vector<1x1x128xf32> to vector<2x8x128xf32>
    %12 = arith.mulf %8, %11 : vector<2x8x128xf32>
    %cst_8 = arith.constant dense<0.000000e+00> : vector<2x8xf32>
    %13 = vector.multi_reduction <add>, %12, %cst_8 [2] : vector<2x8x128xf32> to vector<2x8xf32>
    %cst_9 = arith.constant dense<0xFF800000> : vector<2xf32>
    %14 = vector.multi_reduction <maximumf>, %13, %cst_9 [1] : vector<2x8xf32> to vector<2xf32>
    %15 = vector.shape_cast %14 : vector<2xf32> to vector<2x1xf32>
    %16 = vector.broadcast %15 : vector<2x1xf32> to vector<2x8xf32>
    %17 = arith.subf %13, %16 : vector<2x8xf32>
    %18 = math.exp %17 : vector<2x8xf32>
    %cst_10 = arith.constant dense<0.000000e+00> : vector<2xf32>
    %19 = vector.multi_reduction <add>, %18, %cst_10 [1] : vector<2x8xf32> to vector<2xf32>
    %20 = vector.shape_cast %19 : vector<2xf32> to vector<2x1xf32>
    %21 = tpu.reciprocal %20 {approx = true} : vector<2x1xf32> -> vector<2x1xf32>
    %22 = vector.broadcast %21 : vector<2x1xf32> to vector<2x8xf32>
    %23 = arith.mulf %18, %22 : vector<2x8xf32>
    %24 = vector.shape_cast %23 : vector<2x8xf32> to vector<2x1x8xf32>
    "tpu.trace_start"() <{level = 10 : i32, message = "bqt,btf->bqf"}> : () -> ()
    %cst_11 = arith.constant dense<0.000000e+00> : vector<2x1x128xf32>
    %25 = tpu.matmul %24, %0, %cst_11 {dimension_numbers = #tpu.dot_dimension_numbers<[2], [1], [1], [2], [0, 0, 0, 1, 1, 2], [0], [0]>} : vector<2x1x8xf32>, vector<2x8x128xf32>, vector<2x1x128xf32> -> vector<2x1x128xf32>
    "tpu.trace_stop"() : () -> ()
    %26 = vector.shape_cast %25 : vector<2x1x128xf32> to vector<2x128xf32>
    %c0_12 = arith.constant 0 : index
    %c0_13 = arith.constant 0 : index
    %27 = vector.load %arg5[%c0_12, %c0_13] : memref<2x128xf32, #tpu.memory_space<vmem>>, vector<2x128xf32>
    tpu.vector_store %arg5[%c0_12, %c0_13], %26 {strides = array<i32>} : memref<2x128xf32, #tpu.memory_space<vmem>>, vector<2x128xf32>,
    return
  }
  func.func @transform_0(%arg0: i32) -> (i32, i32, i32) {
    %c0_i32 = arith.constant 0 : i32
    %c0_i32_0 = arith.constant 0 : i32
    %c0_i32_1 = arith.constant 0 : i32
    return %arg0, %c0_i32, %c0_i32_0 : i32, i32, i32
  }
  func.func @transform_1(%arg0: i32) -> (i32, i32) {
    %c0_i32 = arith.constant 0 : i32
    %c0_i32_0 = arith.constant 0 : i32
    %c0_i32_1 = arith.constant 0 : i32
    return %c0_i32, %c0_i32_0 : i32, i32
  }
  func.func @transform_2(%arg0: i32) -> (i32, i32) {
    %c0_i32 = arith.constant 0 : i32
    %c0_i32_0 = arith.constant 0 : i32
    %c0_i32_1 = arith.constant 0 : i32
    return %c0_i32, %c0_i32_0 : i32, i32
  }
  func.func @transform_3(%arg0: i32) -> (i32, i32) {
    %c0_i32 = arith.constant 0 : i32
    %c0_i32_0 = arith.constant 0 : i32
    %c0_i32_1 = arith.constant 0 : i32
    return %c0_i32, %c0_i32_0 : i32, i32
  }
  func.func @transform_4(%arg0: i32) -> (i32, i32) {
    %c0_i32 = arith.constant 0 : i32
    %c0_i32_0 = arith.constant 0 : i32
    return %arg0, %c0_i32 : i32, i32
  }
}

</mosaic_0001>

<bundles_post_ra>
// kernel: attention_layer.1
= control target key start
LH: loop header
LB: loop body
LE: loop exit
PB: predicated region body
PF: predicated region fallthrough
CT: control target
= control target key end

     0   :  { %s642_s0 = inlined_call_operand.vmem [shape: f32[2,8,128], index: 0, kind: input, shape index: {}]   ;;  %s643_s1 = inlined_call_operand.vmem [shape: f32[128,128], index: 1, kind: input, shape index: {}]   ;;  %s644_s2 = inlined_call_operand.vmem [shape: f32[1,128], index: 2, kind: input, shape index: {}]   ;;  %s645_s3 = inlined_call_operand.vmem [shape: f32[1,128], index: 3, kind: input, shape index: {}]   ;;  %s646_s4 = inlined_call_operand.hbm [shape: f32[2,128], index: 4, kind: output, shape index: {}]  }
   0x1   :  { %v20_v0 = vld [vmem:[%s643_s1] sm:$0xff]  ;;  %v21_v1 = vld [vmem:[%s643_s1 + $0x8] sm:$0xff]  ;;  %v22_v2 = vld [vmem:[%s643_s1 + $0x10] sm:$0xff] }
   0x2   :  { %v456_v3 = vpack.c.bf16 %v21_v1, %v20_v0  ;;  %v23_v4 = vld [vmem:[%s643_s1 + $0x18] sm:$0xff]  ;;  %v24_v6 = vld [vmem:[%s643_s1 + $0x20] sm:$0xff]  ;;  %v25_v7 = vld [vmem:[%s643_s1 + $0x28] sm:$0xff] }
   0x3   :  { %v460_v5 = vpack.c.bf16 %v23_v4, %v22_v2  ;;  %v464_v8 = vpack.c.bf16 %v25_v7, %v24_v6  ;;  %v578_v9 = vld [vmem:[%s642_s0] sm:$0xff]  ;;  %v26_v10 = vld [vmem:[%s643_s1 + $0x30] sm:$0xff]  ;;  %v27_v11 = vld [vmem:[%s643_s1 + $0x38] sm:$0xff] }
   0x4   :  { %457 = vmatprep.subr.bf16.mxu0 %v456_v3  ;;  %443 = vmatprep.mubr.f32.mxu0 %v578_v9 }
   0x5   :  { %459 = vmatpush3.bf16.msra.mxu0 %v456_v3 }
   0x6   :  { %461 = vmatprep.subr.bf16.mxu0 %v460_v5 }
   0x7   :  { %9 = vsyncpa [#allocation3], 0  ;;  %v468_v12 = vpack.c.bf16 %v27_v11, %v26_v10  ;;  %v28_v13 = vld [vmem:[%s643_s1 + $0x40] sm:$0xff]  ;;  %v29_v14 = vld [vmem:[%s643_s1 + $0x48] sm:$0xff]  ;;  %v135_v36 = vlaneseq  ;;  %vm145_vm0 = vcmask 1041409   ;;  %vm148_vm1 = vcmask 58368  }
   0x8   :  { %v472_v15 = vpack.c.bf16 %v29_v14, %v28_v13  ;;  %v30_v16 = vld [vmem:[%s643_s1 + $0x50] sm:$0xff]  ;;  %v31_v17 = vld [vmem:[%s643_s1 + $0x58] sm:$0xff]  ;;  %v32_v19 = vld [vmem:[%s643_s1 + $0x60] sm:$0xff]  ;;  %v528_v46 = vmov 0   ;;  %v529_v0 = vmov 0.0   ;;  %vm530_vm2 = vmmov 0  }
   0x9   :  { %463 = vmatpush3.bf16.msra.mxu0 %v460_v5  ;;  %v476_v18 = vpack.c.bf16 %v31_v17, %v30_v16  ;;  %v33_v20 = vld [vmem:[%s643_s1 + $0x68] sm:$0xff]  ;;  %v34_v22 = vld [vmem:[%s643_s1 + $0x70] sm:$0xff]  ;;  %v35_v23 = vld [vmem:[%s643_s1 + $0x78] sm:$0xff]  ;;  %v136_v37 = vand.u32 127, %v135_v36  ;;  %v138_v38 = vshrl.u32 %v135_v36, 7  ;;  %493 = vset.pattern.permute.xlu0 %v528_v46  ;;  %vm212_vm3 = vcmask 64512  }
   0xa   :  { %465 = vmatprep.subr.bf16.mxu0 %v464_v8  ;;  %v480_v21 = vpack.c.bf16 %v33_v20, %v32_v19  ;;  %v484_v24 = vpack.c.bf16 %v35_v23, %v34_v22  ;;  %v614_v25 = vld [vmem:[%s642_s0 + $0x8] sm:$0xff]  ;;  %v385_v26 = vld [vmem:[%s644_s2] ss:$0 sm:$0xff]  ;;  %492 = vset.pattern.permute.xlu1 %v528_v46  ;;  %s531_s0 = smov [#allocation2]  }
   0xb   :  { %v386_v31 = vld [vmem:[%s645_s3] ss:$0 sm:$0xff]  ;;  %v139_v40 = vsub.s32 %v136_v37, %v138_v38  ;;  %v155_v47 = vsub.s32 0, %v138_v38  ;;  %v159_v48 = vsub.s32 1, %v138_v38  ;;  %446 = vmatprep.subr.mxu1 %v529_v0  ;;  %448 = vmatprep.mubr.msk.f32.mxu1 %vm530_vm2, %v529_v0  ;;  %s377_s2 = sshll.u32 %s531_s0, 4  ;;  %s378_s2 = int_to_ptr.vmem [resolvable:$true] %s377_s2 }
   0xc   :  { %447 = vmatpush3.msra.mxu1 %v578_v9  ;;  %s504_s3 = scalar_lea.vmem %s378_s2, 32  ;;  %p509_p1 = scmp.lt.s32.totalorder %s378_s2, %s378_s2 }
   0xd   :  { %467 = vmatpush3.bf16.msra.mxu0 %v464_v8  ;;  %451 = vmatprep.subr.mxu1 %v529_v0  ;;  %p505_p0 = scmp.ne.s32.totalorder %s378_s2, %s504_s3  ;;  %p510_p2 = scmp.lt.s32.totalorder %s504_s3, %s504_s3 }
   0xe   :  { %469 = vmatprep.subr.bf16.mxu0 %v468_v12 }
   0xf   :  { %p511_p3 = por %p510_p2, %p509_p1 }
  0x11   :  { %471 = vmatpush3.bf16.msra.mxu0 %v468_v12  ;;  %p512_p4 = pnand %p511_p3, %p505_p0 }
  0x12   :  { %473 = vmatprep.subr.bf16.mxu0 %v472_v15 }
  0x15   :  { %475 = vmatpush3.bf16.msra.mxu0 %v472_v15 }
  0x16   :  { %477 = vmatprep.subr.bf16.mxu0 %v476_v18 }
  0x19   :  { %479 = vmatpush3.bf16.msra.mxu0 %v476_v18 }
  0x1a   :  { %481 = vmatprep.subr.bf16.mxu0 %v480_v21 }
  0x1d   :  { %483 = vmatpush3.bf16.msra.mxu0 %v480_v21 }
  0x1e   :  { %485 = vmatprep.subr.bf16.mxu0 %v484_v24 }
  0x21   :  { %487 = vmatpush3.bf16.msra.mxu0 %v484_v24 }
  0x24   :  { %444 = vmatmul.mubr.f32.vlgmr.msra.gmra.mrb[0].mxu0 %v614_v25 }
  0xf7   :  { %v445_v27 = vpop.f32.mrb[0].mxu0 }
  0xf8   :  { %v109_v28 = vpop.f32.mrb[1].mxu0  ;;  %v115_v29 = vadd.f32 %v445_v27, %v385_v26 }
  0xf9   :  { %v110_v30 = vadd.f32 %v385_v26, %v109_v28 }
  0xfb   :  { %494 = vtanh.f32 %v110_v30 }
  0xfc   :  { %496 = vtanh.f32 %v115_v29 }
 0x105   :  { %v495_v32 = vpop.eup %494 }
 0x106   :  { %v127_v33 = vmul.f32 %v495_v32, %v386_v31  ;;  %v497_v34 = vpop.eup %496 }
 0x107   :  { %v128_v35 = vmul.f32 %v497_v34, %v386_v31 }
 0x108   :  { %129 = vadd.xlane.f32.xlu0 %v127_v33 }
 0x10c   :  { %131 = vadd.xlane.f32.xlu0 %v128_v35 }
 0x195   :  { %v130_v39 = vpop.xlane.xlu0 %129 }
 0x196   :  { %v140_v42 = vrot.slane %v130_v39, %v139_v40 }
 0x199   :  { %v132_v41 = vpop.xlane.xlu0 %131 }
 0x19a   :  { %v144_v43 = vrot.slane %v132_v41, %v139_v40 }
 0x19c   :  { %v146_v44 = vsel %vm145_vm0, %v144_v43, %v140_v42 }
 0x19d   :  { %v149_v45 = vsel %vm148_vm1, %v146_v44, -inf }
 0x19e   :  { %150 = vmax.xlane.f32.xlu1 %v149_v45 }
 0x22b   :  { %v151_v49 = vpop.xlane.xlu1 %150 }
 0x22c   :  { %v156_v50 = vrot.slane %v151_v49, %v155_v47  ;;  %v160_v51 = vrot.slane %v151_v49, %v159_v48 }
 0x22e   :  { %v163_v52 = vsub.f32 %v130_v39, %v156_v50  ;;  %v164_v53 = vsub.f32 %v132_v41, %v160_v51 }
 0x230   :  { %v165_v54 = vmul.f32 1.442695, %v163_v52  ;;  %v167_v55 = vmul.f32 1.442695, %v164_v53 }
 0x232   :  { %498 = vpow2.f32 %v165_v54 }
 0x233   :  { %500 = vpow2.f32 %v167_v55 }
 0x23c   :  { %v499_v56 = vpop.eup %498 }
 0x23d   :  { %v501_v57 = vpop.eup %500  ;;  %172 = vperm.xlu1 %492, %v499_v56  }
 0x23e   :  { %175 = vperm.xlu0 %493, %v501_v57  }
 0x2bc   :  { %v173_v58 = vpop.permute.xlu1 %172 }
 0x2bd   :  { %v176_v59 = vpop.permute.xlu0 %175  ;;  %v180_v60 = vrot.slane %v173_v58, %v139_v40 }
 0x2be   :  { %v184_v61 = vrot.slane %v176_v59, %v139_v40 }
 0x2c0   :  { %v185_v62 = vsel %vm145_vm0, %v184_v61, %v180_v60 }
 0x2c1   :  { %v187_v63 = vsel %vm148_vm1, %v185_v62, 0.0 }
 0x2c2   :  { %188 = vadd.xlane.f32.xlu1 %v187_v63 }
 0x34f   :  { %v189_v1 = vpop.xlane.xlu1 %188 }
 0x350   :  { %502 = vrcp.f32 %v189_v1 }
 0x35a   :  { %v503_v2 = vpop.eup %502 }
 0x35b   :  { %v195_v3 = vrot.slane %v503_v2, %v155_v47  ;;  %v199_v5 = vrot.slane %v503_v2, %v159_v48 }
 0x35d   :  { %v202_v4 = vmul.f32 %v499_v56, %v195_v3  ;;  %v203_v6 = vmul.f32 %v501_v57, %v199_v5 }
 0x35f   :  { %206 = vperm.xlu0 %493, %v202_v4  }
 0x363   :  { %287 = vperm.xlu0 %493, %v203_v6  }
 0x3de   :  { %v207_v7 = vpop.permute.xlu0 %206 }
 0x3df   :  { %v211_v8 = vrot.slane %v207_v7, %v139_v40 }
 0x3e1   :  { %449 = vmatmul.mubr.msk.f32.vlgmr.msra.gmra.mrb[0].mxu1 %vm212_vm3, %v211_v8 }
 0x3e2   :  { %452 = vmatpush3.msra.mxu1 %v614_v25  ;;  %v288_v10 = vpop.permute.xlu0 %287  ;;  %453 = vmatprep.mubr.msk.f32.mxu1 %vm530_vm2, %v529_v0 }
 0x3e3   :  { %v292_v9 = vrot.slane %v288_v10, %v139_v40 }
 0x3e5   :  { %454 = vmatmul.mubr.msk.f32.vlgmr.msra.gmra.mrb[2].mxu1 %vm212_vm3, %v292_v9 }
 0x4b4   :  { %v281_v11 = vpop.f32.mrb[0].mxu1 }
 0x4b5   :  { %v450_v12 = vpop.f32.mrb[1].mxu1 }
 0x4b8   :  { %v361_v13 = vpop.f32.mrb[2].mxu1 }
 0x4b9   :  { %v367_v14 = vrot.slane %v361_v13, 7  ;;  %v455_v15 = vpop.f32.mrb[3].mxu1 }
 0x4bb   :  { %v368_v16 = vsel %vm145_vm0, %v367_v14, %v281_v11 }
 0x4bc   :  { %370 = vst [vmem:[#allocation2] sm:$0x3] %v368_v16 }
 0x4bd   :  { %515 = shalt.err (!%p512_p4)
}
 0x4be   :  { %s516_s30 = scalar_lea.hbm %s646_s4, 32 }
 0x4bf   :  { %p517_p5 = scmp.ne.s32.totalorder %s646_s4, %s516_s30  ;;  %p520_p6 = scmp.lt.u32.totalorder %s516_s30, %s646_s4 }
 0x4c1   :  { %p522_p7 = pnand %p520_p6, %p517_p5 }
 0x4c3   :  { %525 = shalt.err (!%p522_p7)
}
 0x4c4   :  { %380 = dma.vmem_to_hbm [thread:$0]  %s378_s2, 32, %s646_s4, [#allocation3]  }
 0x4c5   :  { %526 = dma.done.wait [#allocation3], 32  }
 0x4c6   :  { %527 = vsyncadd [#allocation3], 4294967264 }
 0x4c7   :  { %384 = vsyncpa [#allocation3], 1 }

</bundles_post_ra>
